<compile_context>
chip_gen: v7x
topology: tpu7x:2x2x1
jax: 0.10.0
libtpu: 0.0.40
codegen_flags: <defaults>
</compile_context>

<pallas_src>
import jax
import jax.numpy as jnp
from jax.experimental import pallas as pl
from jax.experimental.pallas import tpu as pltpu


def _dup_kernel(x_ref, z_ref):
    """x_ref: (bb, rows, qt); z_ref: (bb, 2, rows, qt).  Write x to both halves."""
    v = x_ref[...]
    z_ref[:, 0, :, :] = v   # first half  (contiguous full-width store)
    z_ref[:, 1, :, :] = v   # second half (contiguous full-width store)


def model_forward(x, *, target_block_bytes=2 * 1024 * 1024):
    b = x.shape[0]
    n_b = x.size // b                       # per-batch element count
    assert n_b % 800 == 0, "per-batch numel must be divisible by 32*25"
    assert x.size % 96 == 0, "total numel must be divisible by 32*3 (module precondition)"
    c = n_b // 800                          # channels of the (B, -1, 32, 25) view

    itemsize = jnp.dtype(x.dtype).itemsize
    rows = max(8, 32 // itemsize)           # dtype-aware sublane tile (8/16/32)
    assert n_b % rows == 0                  # guaranteed by n_b % 800 == 0 (800 % 32 == 0)
    q = n_b // rows                         # lane-dense per-batch width

    target_elems = max(1, target_block_bytes // itemsize)

    if n_b <= target_elems:
        # Small per-batch rows: fuse several batch elements per grid step.
        bb = max(1, min(b, target_elems // n_b))
        if b >= 2:
            bb = min(bb, max(1, b // 2))    # keep >=2 parallel steps for v7x's 2 TCs
        q_tile = q                          # full lane dim -> legal even if q % 128 != 0
    else:
        # Large per-batch rows: tile the lane axis in 128-aligned chunks.
        bb = 1
        q_tile = max(128, (target_elems // rows) // 128 * 128)
        q_tile = min(q_tile, ((q + 127) // 128) * 128)

    grid = (pl.cdiv(b, bb), pl.cdiv(q, q_tile))

    xf = x.reshape(b, rows, q)
    zf = pl.pallas_call(
        _dup_kernel,
        grid=grid,
        in_specs=[pl.BlockSpec((bb, rows, q_tile), lambda i, j: (i, 0, j))],
        out_specs=pl.BlockSpec((bb, 2, rows, q_tile), lambda i, j: (i, 0, 0, j)),
        out_shape=jax.ShapeDtypeStruct((b, 2, rows, q), x.dtype),
        compiler_params=pltpu.CompilerParams(
            dimension_semantics=("parallel", "parallel"),
            vmem_limit_bytes=32 * 1024 * 1024,
        ),
    )(xf)

    # Free row-major reshape back to the torch layout (B, 2C, 32, 25).
    return zf.reshape(b, 2 * c, 32, 25)


if __name__ == "__main__":
    key = jax.random.PRNGKey(0)
    # Small shape consistent with the module's view constraints:
    #   per-batch numel divisible by 32*25 = 800 -> x.view(B,-1,32,25) valid
    #   total numel divisible by 32*3  = 96      -> original x.view(-1,32,3) valid
    x = jax.random.normal(key, (2, 6, 16, 25), dtype=jnp.float32)

    z = model_forward(x)
    jax.block_until_ready(z)

    # Reference check against plain-JAX semantics of the (repaired) forward.
    b = x.shape[0]
    y = x.reshape(b, -1, 32, 25)
    ref = jnp.concatenate([y, y], axis=1)
    assert z.shape == ref.shape, (z.shape, ref.shape)
    assert jnp.array_equal(z, ref)
    print("KERNEL_OK")
</pallas_src>

<mosaic_0001>
module attributes {stable_mosaic.version = 11 : i64} {
  func.func @_dup_kernel(%arg0: i32, %arg1: i32, %arg2: memref<1x8x300xf32, #tpu.memory_space<vmem>>, %arg3: memref<1x2x8x300xf32, #tpu.memory_space<vmem>>) attributes {dimension_semantics = [#tpu.dimension_semantics<parallel>, #tpu.dimension_semantics<parallel>], iteration_bounds = array<i64: 2, 1>, scalar_prefetch = 0 : i64, scratch_operands = 0 : i64, tpu.core_type = #tpu.core_type<tc>, window_params = [{transform_indices = @transform_0, window_bounds = array<i64: 1, 8, 300>}, {transform_indices = @transform_1, window_bounds = array<i64: 1, 2, 8, 300>}]} {
    %c0 = arith.constant 0 : index
    %c0_0 = arith.constant 0 : index
    %c0_1 = arith.constant 0 : index
    %0 = vector.load %arg2[%c0, %c0_0, %c0_1] : memref<1x8x300xf32, #tpu.memory_space<vmem>>, vector<1x8x300xf32>
    %c0_2 = arith.constant 0 : index
    %c0_3 = arith.constant 0 : index
    %c0_4 = arith.constant 0 : index
    %c0_5 = arith.constant 0 : index
    %1 = vector.load %arg3[%c0_2, %c0_3, %c0_4, %c0_5] : memref<1x2x8x300xf32, #tpu.memory_space<vmem>>, vector<1x1x8x300xf32>
    %2 = vector.shape_cast %1 : vector<1x1x8x300xf32> to vector<1x8x300xf32>
    %3 = vector.shape_cast %0 : vector<1x8x300xf32> to vector<1x1x8x300xf32>
    tpu.vector_store %arg3[%c0_2, %c0_3, %c0_4, %c0_5], %3 {strides = array<i32>} : memref<1x2x8x300xf32, #tpu.memory_space<vmem>>, vector<1x1x8x300xf32>,
    %c0_6 = arith.constant 0 : index
    %c1 = arith.constant 1 : index
    %c0_7 = arith.constant 0 : index
    %c0_8 = arith.constant 0 : index
    %4 = vector.load %arg3[%c0_6, %c1, %c0_7, %c0_8] : memref<1x2x8x300xf32, #tpu.memory_space<vmem>>, vector<1x1x8x300xf32>
    %5 = vector.shape_cast %4 : vector<1x1x8x300xf32> to vector<1x8x300xf32>
    %6 = vector.shape_cast %0 : vector<1x8x300xf32> to vector<1x1x8x300xf32>
    tpu.vector_store %arg3[%c0_6, %c1, %c0_7, %c0_8], %6 {strides = array<i32>} : memref<1x2x8x300xf32, #tpu.memory_space<vmem>>, vector<1x1x8x300xf32>,
    return
  }
  func.func @transform_0(%arg0: i32, %arg1: i32) -> (i32, i32, i32) {
    %c0_i32 = arith.constant 0 : i32
    %c0_i32_0 = arith.constant 0 : i32
    return %arg0, %c0_i32, %arg1 : i32, i32, i32
  }
  func.func @transform_1(%arg0: i32, %arg1: i32) -> (i32, i32, i32, i32) {
    %c0_i32 = arith.constant 0 : i32
    %c0_i32_0 = arith.constant 0 : i32
    %c0_i32_1 = arith.constant 0 : i32
    return %arg0, %c0_i32, %c0_i32_0, %arg1 : i32, i32, i32, i32
  }
}

</mosaic_0001>

<bundles_post_ra>
// kernel: tpu_custom_call.1
= control target key start
LH: loop header
LB: loop body
LE: loop exit
PB: predicated region body
PF: predicated region fallthrough
CT: control target
= control target key end

     0   :  { %6 = vsyncpa [#allocation3], 0  ;;  %s649_s0 = inlined_call_operand.hbm [shape: f32[2,8,300], index: 0, kind: input, shape index: {}]   ;;  %s650_s1 = inlined_call_operand.hbm [shape: f32[2,2,8,300], index: 1, kind: output, shape index: {}]  }
   0x1   :  { %8 = vsyncpa [#allocation3 + $0x1], 0 }
   0x2   :  { %9 = vsyncpa [#allocation4], 0 }
   0x3   :  { %11 = vsyncpa [#allocation4 + $0x1], 0  ;;  %s476_s6 = smov 0   ;;  %s478_s7 = smov 0  }
   0x4   :  { %s480_s8 = smov 0   ;;  %s482_s9 = smov 0  }
   0x5   :  { %s484_s10 = smov 0   ;;  %s486_s11 = smov 0  }
   0x6 LB: > { %s267_s12 = sadd.s32 4294967295, %s460_s11   ;;  %s268_s13 = sadd.s32 4294967294, %s460_s11   ;;  %s460_s11 = sphi %s486_s11, %s17_s11   ;;  %s456_s10 = sphi %s484_s10, %s665_s10   ;;  %s452_s9 = sphi %s482_s9, %s664_s9   ;;  %s448_s8 = sphi %s480_s8, %s663_s8   ;;  %s444_s7 = sphi %s478_s7, %s662_s7   ;;  %s440_s6 = sphi %s476_s6, %s661_s6  }
   0x7   : > { %s29_s14 = sadd.s32 1, %s456_s10  ;;  %s38_s15 = sadd.s32 1, %s448_s8 }
   0x8   : > { %p31_p0 = scmp.ge.s32.totalorder %s29_s14, 2  ;;  %p45_p1 = scmp.ne.s32.totalorder %s448_s8, %s444_s7 }
   0x9   : > { %p46_p2 = scmp.eq.s32.totalorder %s460_s11, 0  ;;  %p51_p3 = scmp.ne.s32.totalorder %s444_s7, %s440_s6 }
   0xa   : > { %s667_s14 = smov (%p31_p0, %s29_s14), 0  ;;  %p52_p5 = scmp.eq.s32.totalorder %s267_s12, 0 }
   0xb   : > { %p517_p4 = por %p46_p2, %p45_p1  ;;  %s33_s17 = ssub.s32 %s456_s10, %s667_s14 }
   0xc   : > { %p77_p6 = scmp.eq.s32.totalorder %s267_s12, 1  ;;  %p36_p7 = scmp.eq.s32.totalorder %s33_s17, 0 }
   0xd   : > { %p523_p8 = por %p52_p5, %p51_p3  ;;  %p83_p10 = scmp.eq.s32.totalorder %s268_s13, 1 }
   0xe   : > { %p527_p9 = por %p77_p6, %p45_p1  ;;  %p296_p13 = scmp.lt.s32.totalorder %s460_s11, 2 }
   0xf   : > { %s532_s20 = scalar_select %p36_p7, %s448_s8, %s38_s15  }
  0x10   : > { %s654_s19 = scalar_select %p527_p9, 1, 0 }
  0x11   : > { %p534_p11 = por %p83_p10, %p51_p3  ;;  %s103_s22 = sand.u32 1, %s448_s8  }
  0x12   : > { %s279_s23 = smul.u32 24, %s103_s22  ;;  %p544_p0 = pnand %p296_p13, %p517_p4 }
  0x13   : > { %s655_s21 = scalar_select %p534_p11, 1, 0 }
  0x14   : > { %s280_s24 = smul.u32 384, %s456_s10  ;;  %s107_s29 = scalar_lea.vmem [#allocation2], %s279_s23 }
  0x15   : > { %s117_s30 = sshll.u32 %s107_s29, 4  ;;  %s104_s2 = scalar_lea.sflag [#allocation3], %s103_s22  ;;  %s554_s30 = int_to_ptr.vmem [resolvable:$true] %s117_s30 }
  0x16   : > { %s552_s28 = scalar_lea.hbm %s649_s0, %s280_s24  ;;  %p350_p3 = pneg %p544_p0 }
  0x17   : > { %s348_s3 = scalar_lea.hbm %s552_s28, 384  ;;  %s353_s12 = scalar_lea.hbm %s649_s0, 768 }
  0x18   : > { %p349_p2 = scmp.ne.s32.totalorder %s552_s28, %s348_s3  ;;  %p354_p6 = scmp.lt.u32.totalorder %s552_s28, %s649_s0 }
  0x19   : > { %p355_p7 = scmp.lt.u32.totalorder %s353_s12, %s348_s3  ;;  %p357_p13 = scmp.lt.u32.totalorder %s348_s3, %s552_s28 }
  0x1a   : > { %p351_p4 = pnand %p350_p3, %p349_p2 }
  0x1b   : > { %p356_p10 = por %p355_p7, %p354_p6 }
  0x1c   : > { %p352_p5 = pneg %p351_p4 }
  0x1d   : > { %p358_p12 = por %p357_p13, %p356_p10 }
  0x1f   : > { %p359_p1 = pnand %p358_p12, %p352_p5 }
  0x21   : > { %362 = shalt.err (!%p359_p1)
}
  0x22   : > { %s363_s16 = scalar_lea.vmem %s554_s30, 384  ;;  %s462_s17 = smov [#allocation2]  }
  0x23   : > { %p364_p2 = scmp.ne.s32.totalorder %s554_s30, %s363_s16  ;;  %s368_s22 = sshll.u32 %s462_s17, 4  ;;  %s369_s22 = int_to_ptr.vmem [resolvable:$false] %s368_s22 }
  0x24   : > { %s370_s23 = scalar_lea.vmem %s369_s22, 768  ;;  %p371_p9 = scmp.lt.s32.totalorder %s554_s30, %s369_s22 }
  0x25   : > { %p366_p4 = pnand %p364_p2, %p350_p3  ;;  %p372_p6 = scmp.lt.s32.totalorder %s370_s23, %s363_s16 }
  0x27   : > { %p367_p11 = pneg %p366_p4  ;;  %p373_p7 = por %p372_p6, %p371_p9 }
  0x29   : > { %p374_p10 = pnand %p373_p7, %p367_p11 }
  0x2b   : > { %377 = shalt.err (!%p374_p10)
}
  0x2c   : > { %291 = dma.hbm_to_vmem [thread:$0]  (!%p544_p0), %s552_s28, 384, %s554_s30, %s104_s2  }
  0x2d   : > { %p122_p12 = scmp.lt.s32.totalorder %s460_s11, 3  ;;  %p657_p1 = scmp.ge.s32.totalorder %s460_s11, 1 }
  0x2f   : > { %p123_p3 = pnand %p657_p1, %p122_p12 }
  0x30   : > { %s585_s24 = sand.u32 (!%p123_p3), 1, %s444_s7  }
  0x31   : > { %126 = sbr.rel (%p123_p3) target bundleno = 84 (0x54), region = 24  ;;  %s129_s27 = scalar_lea.sflag (!%p123_p3), [#allocation3], %s585_s24 }
  0x32   : > { %s281_s26 = smul.u32 (!%p123_p3), 24, %s585_s24 }
  0x34   : > { %s132_s29 = scalar_lea.vmem (!%p123_p3), [#allocation2], %s281_s26 }
  0x38   : > { %431 = dma.done.wait (%p523_p8), %s129_s27, 384  }
  0x39   : > { %433 = vsyncadd (%p523_p8), %s129_s27, 4294966912  ;;  %s282_s25 = smul.u32 48, %s585_s24  ;;  %vm158_vm0 = vcmask 359424   ;;  %v153_v0 = vld [vmem:[%s132_s29] sm:$0xff]  ;;  %v154_v1 = vld [vmem:[%s132_s29 + $0x8] sm:$0xff]  ;;  %p658_p9 = scmp.ne.s32.totalorder %s654_s19, 0 }
  0x3a   : > { %s283_s28 = smul.u32 768, %s452_s9  ;;  %v155_v2 = vld [vmem:[%s132_s29 + $0x10] sm:$0xff]  ;;  %s165_s9 = scalar_lea.sflag [#allocation4], %s585_s24 }
  0x3b   : > { %s150_s30 = scalar_lea.vmem [#allocation5], %s282_s25  ;;  %s463_s12 = smov [#allocation5]  }
  0x3c   : > { %s180_s2 = sshll.u32 %s150_s30, 4  ;;  %s600_s5 = scalar_lea.hbm %s650_s1, %s283_s28  ;;  %156 = vst [vmem:[%s150_s30] sm:$0xff] %v153_v0  ;;  %273 = vst [vmem:[%s150_s30 + $0x18] sm:$0xff] %v153_v0  ;;  %s595_s2 = int_to_ptr.vmem [resolvable:$true] %s180_s2 }
  0x3d   : > { %157 = vst [vmem:[%s150_s30 + $0x8] sm:$0xff] %v154_v1  ;;  %274 = vst [vmem:[%s150_s30 + $0x20] sm:$0xff] %v154_v1  ;;  %s378_s18 = scalar_lea.vmem %s595_s2, 768  ;;  %s382_s13 = sshll.u32 %s463_s12, 4  ;;  %s383_s13 = int_to_ptr.vmem [resolvable:$false] %s382_s13 }
  0x3e   : > { %159 = vst.msk [vmem:[%s150_s30 + $0x10] sm:$0xff] %vm158_vm0, %v155_v2  ;;  %275 = vst.msk [vmem:[%s150_s30 + $0x28] sm:$0xff] %vm158_vm0, %v155_v2  ;;  %p379_p8 = scmp.ne.s32.totalorder %s595_s2, %s378_s18  ;;  %s384_s15 = scalar_lea.vmem %s383_s13, 1536 }
  0x3f   : > { %p385_p5 = scmp.lt.s32.totalorder %s595_s2, %s383_s13  ;;  %p386_p13 = scmp.lt.s32.totalorder %s384_s15, %s378_s18 }
  0x40   : > { %p380_p11 = pnand %p379_p8, %p658_p9 }
  0x41   : > { %p387_p2 = por %p386_p13, %p385_p5 }
  0x42   : > { %p381_p0 = pneg %p380_p11 }
  0x44   : > { %p388_p4 = pnand %p387_p2, %p381_p0 }
  0x46   : > { %391 = shalt.err (!%p388_p4)
}
  0x47   : > { %s392_s16 = scalar_lea.hbm %s600_s5, 768  ;;  %s396_s23 = scalar_lea.hbm %s650_s1, 1536 }
  0x48   : > { %p393_p6 = scmp.ne.s32.totalorder %s600_s5, %s392_s16  ;;  %p397_p12 = scmp.lt.u32.totalorder %s600_s5, %s650_s1 }
  0x49   : > { %p398_p1 = scmp.lt.u32.totalorder %s396_s23, %s392_s16  ;;  %p400_p8 = scmp.lt.u32.totalorder %s392_s16, %s600_s5 }
  0x4a   : > { %p394_p7 = pnand %p393_p6, %p658_p9 }
  0x4b   : > { %p399_p3 = por %p398_p1, %p397_p12 }
  0x4c   : > { %p395_p10 = pneg %p394_p7 }
  0x4d   : > { %p401_p11 = por %p400_p8, %p399_p3 }
  0x4f   : > { %p402_p0 = pnand %p401_p11, %p395_p10 }
  0x51   : > { %405 = shalt.err (!%p402_p0)
}
  0x52   : > { %s464_s29 = smov 384   ;;  %s465_s25 = smov 24  }
  0x53   : > { %286 = dma.vmem_to_hbm [thread:$0]  (%p658_p9), %s595_s2, 768, %s600_s5, %s165_s9, %s464_s29, %s464_s29, %s465_s25  }
  0x54 PF: > { %s195_s28 = sand.u32 1, %s440_s6   ;;  %p659_p5 = scmp.ne.s32.totalorder %s655_s21, 0 }
  0x55   : > { %p660_p13 = scmp.ge.s32.totalorder %s460_s11, 2  ;;  %s196_s30 = scalar_lea.sflag [#allocation4], %s195_s28 }
  0x57   : > { %p293_p2 = pnand %p660_p13, %p659_p5 }
  0x59   : > { %435 = dma.done.wait (!%p293_p2), %s196_s30, 768  }
  0x5a   : > { %437 = vsyncadd (!%p293_p2), %s196_s30, 4294966528  ;;  %s17_s11 = sadd.s32 1, %s460_s11   ;;  %s661_s6 = smov %s444_s7 }
  0x5b   : > { %p14_p4 = scmp.ge.s32.totalorder %s17_s11, 4   ;;  %s662_s7 = smov %s448_s8 }
  0x5c   : > { %s663_s8 = smov %s532_s20  ;;  %s664_s9 = smov %s456_s10 }
  0x5d   : > { %s665_s10 = smov %s667_s14  ;;  %16 = sbr.rel (!%p14_p4) target bundleno = 6 (0x6), region = 70 }
  0x64   :  { %201 = vsyncpa [#allocation3], 1 }
  0x65   :  { %203 = vsyncpa [#allocation3 + $0x1], 1 }
  0x66   :  { %204 = vsyncpa [#allocation4], 1 }
  0x67   :  { %206 = vsyncpa [#allocation4 + $0x1], 1 }

</bundles_post_ra>
